<compile_context>
chip_gen: v6e
topology: v6e:2x2x1
jax: 0.10.0
libtpu: 0.0.40
codegen_flags: <defaults>
</compile_context>

<pallas_src>
import jax
import jax.numpy as jnp
from jax.experimental import pallas as pl
from jax.experimental.pallas import tpu as pltpu


def _st_embedding_kernel(te_ref, tw1_ref, tb1_ref, w2t_ref, bflat_ref, o_ref):
    # [tm, F_in] @ [F_in, D] + [1, D] -> ReLU -> [tm, D]
    te_h = jnp.maximum(
        jnp.dot(te_ref[...], tw1_ref[...], preferred_element_type=jnp.float32)
        + tb1_ref[...],
        0.0,
    )
    # [tm, D] @ [D, N*D] + [1, N*D]  ->  single lane-dense store of [tm, N*D].
    # bflat already contains se_emb[n, :] + te_b2, so this IS  te_emb + se_emb.
    o_ref[...] = (
        jnp.dot(te_h, w2t_ref[...], preferred_element_type=jnp.float32)
        + bflat_ref[...]
    ).astype(o_ref.dtype)


def st_embedding_forward(SE, TE_onehot, params, *, tm=1024):
    """Fused STEmbedding forward.  Returns [B, S, N, D] float32."""
    B, S, F_in = TE_onehot.shape
    N, SE_dim = SE.shape
    D = params["te_w2"].shape[1]
    M = B * S

    # ---- SE MLP (tiny, [N, SE_dim] -> [N, D]); pure JAX, computed once ----
    se_emb = (
        jnp.maximum(SE.astype(jnp.float32) @ params["se_w1"] + params["se_b1"], 0.0)
        @ params["se_w2"]
        + params["se_b2"]
    )                                                              # [N, D]

    # ---- fold the broadcast-add into the second TE matmul ----
    #   out[r, n*D + d] = sum_k te_h[r,k] * te_w2[k,d] + (se_emb[n,d] + te_b2[d])
    w2_tiled = jnp.tile(params["te_w2"], (1, N))                    # [D, N*D]
    bias_flat = (se_emb + params["te_b2"]).reshape(1, N * D)        # [1, N*D]

    te_flat = TE_onehot.reshape(M, F_in).astype(jnp.float32)

    # Row tile: multiple of 8 (sublane rule); no bigger than the rounded-up problem.
    tm = max(8, (int(tm) // 8) * 8)
    tm = min(tm, pl.cdiv(M, 8) * 8)
    grid = (pl.cdiv(M, tm),)

    # Constant index_map -> block stays VMEM-resident across grid steps.
    const = lambda shape: pl.BlockSpec(shape, lambda i: (0, 0))

    out_flat = pl.pallas_call(
        _st_embedding_kernel,
        out_shape=jax.ShapeDtypeStruct((M, N * D), jnp.float32),
        grid=grid,
        in_specs=[
            pl.BlockSpec((tm, F_in), lambda i: (i, 0)),   # TE rows: tiled over grid
            const(params["te_w1"].shape),                 # resident weights / biases
            const(params["te_b1"].shape),
            const((D, N * D)),
            const((1, N * D)),
        ],
        out_specs=pl.BlockSpec((tm, N * D), lambda i: (i, 0)),   # lane-dense output
        compiler_params=pltpu.CompilerParams(
            dimension_semantics=("parallel",),
        ),
    )(te_flat, params["te_w1"], params["te_b1"], w2_tiled, bias_flat)

    # [M, N*D] -> [B, S, N, D]; reshape is metadata-only (row-major contiguous).
    return out_flat.reshape(B, S, N, D)


def init_params(key, T, D, SE_dim):
    ks = jax.random.split(key, 4)
    s = lambda k, shape, fan_in: (jax.random.normal(k, shape, jnp.float32)
                                  / jnp.sqrt(jnp.float32(fan_in)))
    return {
        "se_w1": s(ks[0], (SE_dim, D), SE_dim),
        "se_b1": jnp.zeros((1, D), jnp.float32),
        "se_w2": s(ks[1], (D, D), D),
        "se_b2": jnp.zeros((1, D), jnp.float32),
        "te_w1": s(ks[2], (T + 7, D), T + 7),
        "te_b1": jnp.zeros((1, D), jnp.float32),
        "te_w2": s(ks[3], (D, D), D),
        "te_b2": jnp.zeros((1, D), jnp.float32),
    }


if __name__ == "__main__":
    # Small, deterministic example shapes.
    T = 4          # time steps per day  -> TE feature dim = T + 7 = 11
    D = 32         # output embedding dim
    SE_dim = 16    # node2vec embedding dim
    N = 8          # number of monitoring nodes   (N*D = 256, lane-dense)
    B = 2          # batch size
    S = 6          # P + Q history + horizon steps (B*S = 12)

    key = jax.random.PRNGKey(0)
    kp, kse, kte = jax.random.split(key, 3)

    params = init_params(kp, T, D, SE_dim)
    SE = jax.random.normal(kse, (N, SE_dim), jnp.float32)
    # one-hot TE (time-of-day + day-of-week concatenated)
    tod = jax.nn.one_hot(jax.random.randint(kte, (B, S), 0, T), T)
    dow = jax.nn.one_hot(jax.random.randint(jax.random.fold_in(kte, 1), (B, S), 0, 7), 7)
    TE_onehot = jnp.concatenate([tod, dow], axis=-1).astype(jnp.float32)  # [B, S, T+7]

    # tm=8 so the small example exercises a multi-step grid with a ragged
    # last block (M=12, grid=(2,)) -- no wrapper pad, no output slice.
    out = st_embedding_forward(SE, TE_onehot, params, tm=8)
    jax.block_until_ready(out)

    # Sanity check against a pure-JAX reference.
    def ref_mlp(x, w1, b1, w2, b2):
        return jnp.maximum(x @ w1 + b1, 0.0) @ w2 + b2

    se_ref = ref_mlp(SE, params["se_w1"], params["se_b1"],
                     params["se_w2"], params["se_b2"])
    te_ref = ref_mlp(TE_onehot.reshape(B * S, T + 7),
                     params["te_w1"], params["te_b1"],
                     params["te_w2"], params["te_b2"]).reshape(B, S, D)
    ref = te_ref[:, :, None, :] + se_ref[None, None, :, :]

    assert out.shape == (B, S, N, D)
    assert jnp.allclose(out, ref, atol=1e-5, rtol=1e-5)

    print("KERNEL_OK")
</pallas_src>

<mosaic_0001>
module attributes {stable_mosaic.version = 11 : i64} {
  func.func @_st_embedding_kernel(%arg0: i32, %arg1: memref<8x11xf32, #tpu.memory_space<vmem>>, %arg2: memref<11x32xf32, #tpu.memory_space<vmem>>, %arg3: memref<1x32xf32, #tpu.memory_space<vmem>>, %arg4: memref<32x256xf32, #tpu.memory_space<vmem>>, %arg5: memref<1x256xf32, #tpu.memory_space<vmem>>, %arg6: memref<8x256xf32, #tpu.memory_space<vmem>>) attributes {dimension_semantics = [#tpu.dimension_semantics<parallel>], iteration_bounds = array<i64: 2>, scalar_prefetch = 0 : i64, scratch_operands = 0 : i64, tpu.core_type = #tpu.core_type<tc>, window_params = [{transform_indices = @transform_0, window_bounds = array<i64: 8, 11>}, {pipeline_mode = #tpu.pipeline_mode<synchronous>, transform_indices = @transform_1, window_bounds = array<i64: 11, 32>}, {pipeline_mode = #tpu.pipeline_mode<synchronous>, transform_indices = @transform_2, window_bounds = array<i64: 1, 32>}, {pipeline_mode = #tpu.pipeline_mode<synchronous>, transform_indices = @transform_3, window_bounds = array<i64: 32, 256>}, {pipeline_mode = #tpu.pipeline_mode<synchronous>, transform_indices = @transform_4, window_bounds = array<i64: 1, 256>}, {transform_indices = @transform_5, window_bounds = array<i64: 8, 256>}]} {
    %c0 = arith.constant 0 : index
    %c0_0 = arith.constant 0 : index
    %0 = vector.load %arg1[%c0, %c0_0] : memref<8x11xf32, #tpu.memory_space<vmem>>, vector<8x11xf32>
    %c0_1 = arith.constant 0 : index
    %c0_2 = arith.constant 0 : index
    %1 = vector.load %arg2[%c0_1, %c0_2] : memref<11x32xf32, #tpu.memory_space<vmem>>, vector<11x32xf32>
    %cst = arith.constant dense<0.000000e+00> : vector<8x32xf32>
    %2 = tpu.matmul %0, %1, %cst {dimension_numbers = #tpu.dot_dimension_numbers<[1], [0], [0], [1], [0, 0, 1, 1], [], []>} : vector<8x11xf32>, vector<11x32xf32>, vector<8x32xf32> -> vector<8x32xf32>
    %c0_3 = arith.constant 0 : index
    %c0_4 = arith.constant 0 : index
    %3 = vector.load %arg3[%c0_3, %c0_4] : memref<1x32xf32, #tpu.memory_space<vmem>>, vector<1x32xf32>
    %4 = vector.broadcast %3 : vector<1x32xf32> to vector<8x32xf32>
    %5 = arith.addf %2, %4 : vector<8x32xf32>
    %cst_5 = arith.constant 0.000000e+00 : f32
    %6 = vector.broadcast %cst_5 : f32 to vector<8x32xf32>
    %7 = arith.maximumf %5, %6 : vector<8x32xf32>
    %c0_6 = arith.constant 0 : index
    %c0_7 = arith.constant 0 : index
    %8 = vector.load %arg4[%c0_6, %c0_7] : memref<32x256xf32, #tpu.memory_space<vmem>>, vector<32x256xf32>
    %cst_8 = arith.constant dense<0.000000e+00> : vector<8x256xf32>
    %9 = tpu.matmul %7, %8, %cst_8 {dimension_numbers = #tpu.dot_dimension_numbers<[1], [0], [0], [1], [0, 0, 1, 1], [], []>} : vector<8x32xf32>, vector<32x256xf32>, vector<8x256xf32> -> vector<8x256xf32>
    %c0_9 = arith.constant 0 : index
    %c0_10 = arith.constant 0 : index
    %10 = vector.load %arg5[%c0_9, %c0_10] : memref<1x256xf32, #tpu.memory_space<vmem>>, vector<1x256xf32>
    %11 = vector.broadcast %10 : vector<1x256xf32> to vector<8x256xf32>
    %12 = arith.addf %9, %11 : vector<8x256xf32>
    %c0_11 = arith.constant 0 : index
    %c0_12 = arith.constant 0 : index
    %13 = vector.load %arg6[%c0_11, %c0_12] : memref<8x256xf32, #tpu.memory_space<vmem>>, vector<8x256xf32>
    tpu.vector_store %arg6[%c0_11, %c0_12], %12 {strides = array<i32>} : memref<8x256xf32, #tpu.memory_space<vmem>>, vector<8x256xf32>,
    return
  }
  func.func @transform_0(%arg0: i32) -> (i32, i32) {
    %c0_i32 = arith.constant 0 : i32
    %c0_i32_0 = arith.constant 0 : i32
    return %arg0, %c0_i32 : i32, i32
  }
  func.func @transform_1(%arg0: i32) -> (i32, i32) {
    %c0_i32 = arith.constant 0 : i32
    %c0_i32_0 = arith.constant 0 : i32
    %c0_i32_1 = arith.constant 0 : i32
    return %c0_i32, %c0_i32_0 : i32, i32
  }
  func.func @transform_2(%arg0: i32) -> (i32, i32) {
    %c0_i32 = arith.constant 0 : i32
    %c0_i32_0 = arith.constant 0 : i32
    %c0_i32_1 = arith.constant 0 : i32
    return %c0_i32, %c0_i32_0 : i32, i32
  }
  func.func @transform_3(%arg0: i32) -> (i32, i32) {
    %c0_i32 = arith.constant 0 : i32
    %c0_i32_0 = arith.constant 0 : i32
    %c0_i32_1 = arith.constant 0 : i32
    return %c0_i32, %c0_i32_0 : i32, i32
  }
  func.func @transform_4(%arg0: i32) -> (i32, i32) {
    %c0_i32 = arith.constant 0 : i32
    %c0_i32_0 = arith.constant 0 : i32
    %c0_i32_1 = arith.constant 0 : i32
    return %c0_i32, %c0_i32_0 : i32, i32
  }
  func.func @transform_5(%arg0: i32) -> (i32, i32) {
    %c0_i32 = arith.constant 0 : i32
    %c0_i32_0 = arith.constant 0 : i32
    return %arg0, %c0_i32 : i32, i32
  }
}

</mosaic_0001>

<bundles_post_ra>
// kernel: tpu_custom_call.1
= control target key start
LH: loop header
LB: loop body
LE: loop exit
PB: predicated region body
PF: predicated region fallthrough
CT: control target
= control target key end

     0   :  { %10 = vsyncpa [#allocation3], 0  ;;  %s1026_s0 = inlined_call_operand.hbm [shape: f32[12,11], index: 0, kind: input, shape index: {}]   ;;  %s1027_s1 = inlined_call_operand.hbm [shape: f32[11,32], index: 1, kind: input, shape index: {}]   ;;  %s1028_s2 = inlined_call_operand.vmem [shape: f32[1,32], index: 2, kind: input, shape index: {}]   ;;  %s1029_s3 = inlined_call_operand.hbm [shape: f32[32,256], index: 3, kind: input, shape index: {}]   ;;  %s1030_s4 = inlined_call_operand.vmem [shape: f32[1,256], index: 4, kind: input, shape index: {}]   ;;  %s1031_s5 = inlined_call_operand.hbm [shape: f32[12,256], index: 5, kind: output, shape index: {}]  }
   0x1   :  { %12 = vsyncpa [#allocation3 + $0x1], 0 }
   0x2   :  { %13 = vsyncpa [#allocation6], 0 }
   0x3   :  { %14 = vsyncpa [#allocation4], 0 }
   0x4   :  { %16 = vsyncpa [#allocation4 + $0x1], 0  ;;  %s854_s18 = smov 0   ;;  %s856_s19 = smov 0  }
   0x5   :  { %s858_s20 = smov 0   ;;  %s860_s21 = smov 0  }
   0x6 LB: > { %s875_s22 = sadd.s32 4294967295, %s812_s21   ;;  %s559_s23 = sadd.s32 4294967294, %s812_s21   ;;  %s812_s21 = sphi %s860_s21, %s1053_s21   ;;  %s808_s20 = sphi %s858_s20, %s1052_s20   ;;  %s804_s19 = sphi %s856_s19, %s1051_s19   ;;  %s800_s18 = sphi %s854_s18, %s1050_s18  }
   0x7   : > { %p42_p0 = scmp.ne.s32.totalorder %s804_s19, %s800_s18  ;;  %p1032_p1 = scmp.eq.s32.totalorder %s875_s22, 0 }
   0x8   : > { %p156_p3 = scmp.eq.s32.totalorder %s559_s23, 1  ;;  %p560_p5 = scmp.ge.s32.totalorder %s812_s21, 1 }
   0x9   : > { %p884_p4 = por %p1032_p1, %p42_p0  ;;  %p163_p7 = scmp.lt.s32.totalorder %s812_s21, 3 }
   0xa   : > { %p889_p6 = por %p156_p3, %p42_p0  ;;  %s814_s27 = smov [#allocation5]  }
   0xb   : > { %s1036_s24 = scalar_select %p884_p4, 1, 0 }
   0xc   : > { %s1037_s25 = scalar_select %p889_p6, 1, 0 }
   0xd   : > { %p894_p8 = pnand %p560_p5, %p163_p7  ;;  %s175_s28 = sshll.u32 %s814_s27, 4  ;;  %s176_s28 = int_to_ptr.vmem [resolvable:$true] %s175_s28 }
   0xe   : > { %s815_s30 = smov [#allocation7]   ;;  %s675_s7 = scalar_lea.vmem %s176_s28, 256 }
   0xf   : > { %s1038_s26 = scalar_select %p894_p8, 1, 0 }
  0x10   : > { %p603_p9 = pneg %p894_p8  ;;  %s191_s6 = sshll.u32 %s815_s30, 4  ;;  %s192_s6 = int_to_ptr.vmem [resolvable:$true] %s191_s6 }
  0x11   : > { %p676_p13 = scmp.ne.s32.totalorder %s176_s28, %s675_s7  ;;  %p683_p5 = scmp.lt.s32.totalorder %s176_s28, %s176_s28 }
  0x12   : > { %p903_p11 = pnand %p603_p9, %p1032_p1  ;;  %p684_p7 = scmp.lt.s32.totalorder %s675_s7, %s675_s7 }
  0x14   : > { %p666_p12 = pneg %p903_p11  ;;  %p685_p10 = por %p684_p7, %p683_p5 }
  0x16   : > { %p678_p0 = pnand %p676_p13, %p666_p12 }
  0x18   : > { %p679_p3 = pneg %p678_p0 }
  0x1a   : > { %p686_p9 = pnand %p685_p10, %p679_p3 }
  0x1c   : > { %689 = shalt.err (!%p686_p9)
}
  0x1d   : > { %s816_s8 = smov 128   ;;  %s817_s9 = smov 8  }
  0x1e   : > { %606 = dma.hbm_to_vmem [thread:$0]  (!%p903_p11), %s1027_s1, 256, %s176_s28, [#allocation6], %s816_s8, %s816_s8, %s817_s9  }
  0x1f   : > { %s701_s12 = scalar_lea.vmem %s192_s6, 1024  ;;  %p709_p2 = scmp.lt.s32.totalorder %s192_s6, %s192_s6 }
  0x20   : > { %p702_p1 = scmp.ne.s32.totalorder %s192_s6, %s701_s12  ;;  %p710_p6 = scmp.lt.s32.totalorder %s701_s12, %s701_s12 }
  0x22   : > { %p704_p13 = pnand %p702_p1, %p666_p12  ;;  %p711_p5 = por %p710_p6, %p709_p2 }
  0x24   : > { %p705_p0 = pneg %p704_p13 }
  0x26   : > { %p712_p10 = pnand %p711_p5, %p705_p0 }
  0x28   : > { %715 = shalt.err (!%p712_p10)
}
  0x29   : > { %s818_s13 = smov 256   ;;  %s819_s14 = smov 16  }
  0x2a   : > { %609 = dma.hbm_to_vmem [thread:$0]  (!%p903_p11), %s1029_s3, 1024, %s192_s6, [#allocation6], %s818_s13, %s818_s13, %s819_s14  }
  0x2b   : > { %s926_s17 = sadd.s32 1, %s812_s21   ;;  %s29_s27 = sadd.s32 1, %s808_s20 }
  0x2c   : > { %s26_s23 = ssub.s32 %s812_s21, %s926_s17  ;;  %p36_p2 = scmp.ne.s32.totalorder %s808_s20, %s804_s19 }
  0x2d   : > { %p27_p1 = scmp.eq.s32.totalorder %s26_s23, 0  ;;  %p37_p6 = scmp.eq.s32.totalorder %s812_s21, 0 }
  0x2e   : > { %p1040_p3 = scmp.eq.s32.totalorder %s875_s22, 1  ;;  %p620_p9 = scmp.lt.s32.totalorder %s812_s21, 2 }
  0x2f   : > { %s935_s28 = scalar_select %p27_p1, %s808_s20, %s29_s27  }
  0x30   : > { %p38_p12 = por %p37_p6, %p36_p2  ;;  %p939_p7 = por %p1040_p3, %p36_p2 }
  0x31   : > { %s208_s29 = sand.u32 1, %s808_s20   ;;  %s565_s6 = sshll.u32 %s812_s21, 7 }
  0x32   : > { %s1041_s30 = scalar_select %p939_p7, 1, 0 }
  0x33   : > { %s564_s7 = sshll.u32 %s208_s29, 3  ;;  %s949_s10 = scalar_lea.hbm %s1026_s0, %s565_s6 }
  0x34   : > { %s212_s11 = scalar_lea.vmem [#allocation2], %s564_s7  ;;  %p951_p11 = pnand %p620_p9, %p38_p12 }
  0x35   : > { %s219_s12 = sshll.u32 %s212_s11, 4  ;;  %s209_s14 = scalar_lea.sflag [#allocation3], %s208_s29  ;;  %s220_s12 = int_to_ptr.vmem [resolvable:$true] %s219_s12 }
  0x36   : > { %s716_s15 = scalar_lea.hbm %s949_s10, 128  ;;  %p718_p0 = pneg %p951_p11 }
  0x37   : > { %p717_p13 = scmp.ne.s32.totalorder %s949_s10, %s716_s15  ;;  %s721_s27 = scalar_lea.hbm %s1026_s0, 256 }
  0x38   : > { %p722_p1 = scmp.lt.s32.totalorder %s949_s10, %s1026_s0  ;;  %p723_p2 = scmp.lt.s32.totalorder %s721_s27, %s716_s15 }
  0x39   : > { %p719_p5 = pnand %p718_p0, %p717_p13 }
  0x3a   : > { %p724_p6 = por %p723_p2, %p722_p1 }
  0x3b   : > { %p720_p10 = pneg %p719_p5 }
  0x3d   : > { %p725_p12 = pnand %p724_p6, %p720_p10 }
  0x3f   : > { %728 = shalt.err (!%p725_p12)
}
  0x40   : > { %s729_s8 = scalar_lea.vmem %s220_s12, 128  ;;  %s820_s29 = smov [#allocation2]  }
  0x41   : > { %p730_p3 = scmp.ne.s32.totalorder %s220_s12, %s729_s8  ;;  %s734_s9 = sshll.u32 %s820_s29, 4  ;;  %s735_s9 = int_to_ptr.vmem [resolvable:$false] %s734_s9 }
  0x42   : > { %s736_s11 = scalar_lea.vmem %s735_s9, 256  ;;  %p737_p13 = scmp.lt.s32.totalorder %s220_s12, %s735_s9 }
  0x43   : > { %p732_p9 = pnand %p730_p3, %p718_p0  ;;  %p738_p5 = scmp.lt.s32.totalorder %s736_s11, %s729_s8 }
  0x45   : > { %p733_p7 = pneg %p732_p9  ;;  %p739_p4 = por %p738_p5, %p737_p13 }
  0x47   : > { %p740_p8 = pnand %p739_p4, %p733_p7 }
  0x49   : > { %743 = shalt.err (!%p740_p8)
}
  0x4a   : > { %613 = dma.hbm_to_vmem [thread:$0]  (!%p951_p11), %s949_s10, 128, %s220_s12, %s209_s14  }
  0x4b   : > { %p1043_p10 = scmp.ne.s32.totalorder %s1038_s26, 0 }
  0x4c   : > { %s972_s15 = sand.u32 (!%p1043_p10), 1, %s804_s19   ;;  %p1044_p0 = scmp.ne.s32.totalorder (!%p1043_p10), %s1036_s24, 0 }
  0x4d   : > { %228 = sbr.rel (%p1043_p10) target bundleno = 498 (0x1f2), region = 40  ;;  %s567_s16 = sshll.u32 (!%p1043_p10), %s972_s15, 3 }
  0x4e   : > { %s231_s23 = scalar_lea.sflag (!%p1043_p10), [#allocation3], %s972_s15  ;;  %s234_s27 = scalar_lea.vmem (!%p1043_p10), [#allocation2], %s567_s16 }
  0x52   : > { %787 = dma.done.wait (%p1044_p0), %s231_s23, 128  }
  0x53   : > { %789 = vsyncadd (%p1044_p0), %s231_s23, 4294967168  ;;  %p1045_p4 = scmp.eq.s32.totalorder %s875_s22, 0 }
  0x55   : > { %791 = dma.done.wait (%p1045_p4), [#allocation6], 1280   ;;  %p1046_p8 = pmov %p1045_p4 }
  0x56   : > { %v821_v0 = vmov 0.0   ;;  %vm822_vm0 = vmmov 0   ;;  %vm283_vm1 = vcmask 1042432   ;;  %v271_v1 = vld [vmem:[#allocation5 + $0x8] sm:$0x7]  ;;  %v270_v2 = vld [vmem:[#allocation5] sm:$0xff]  ;;  %v368_v17 = vlaneseq }
  0x57   : > { %793 = vsyncadd (%p1046_p8), [#allocation6], 4294966016  ;;  %584 = vmatprep.subr.mxu0 %v821_v0  ;;  %588 = vmatprep.mubr.msk.f32.mxu0 %vm822_vm0, %v821_v0  ;;  %v269_v3 = vld [vmem:[%s234_s27] sm:$0xff]  ;;  %vm279_vm2 = vcmask 89088   ;;  %v365_v4 = vld [vmem:[#allocation7 + $0x38] sm:$0xff]  ;;  %vm378_vm3 = vcmask 261120  }
  0x58   : > { %446 = vmatprep.mubr.f32.mxu1 %v821_v0  ;;  %585 = vmatpush3.msk.msra.mxu0 %vm283_vm1, %v271_v1  ;;  %v364_v5 = vld [vmem:[#allocation7 + $0x30] sm:$0xff]  ;;  %v363_v6 = vld [vmem:[#allocation7 + $0x28] sm:$0xff]  ;;  %v362_v7 = vld [vmem:[#allocation7 + $0x20] sm:$0xff]  ;;  %v369_v18 = vshrl.u32 %v368_v17, 7  ;;  %s570_s10 = sshll.u32 %s972_s15, 4  ;;  %s580_s14 = sshll.u32 %s875_s22, 8 }
  0x59   : > { %586 = vmatprep.subr.mxu0 %v821_v0  ;;  %406 = vmatprep.subr.mxu1 %v365_v4  ;;  %v361_v8 = vld [vmem:[#allocation7 + $0x18] sm:$0xff]  ;;  %v360_v9 = vld [vmem:[#allocation7 + $0x10] sm:$0xff]  ;;  %v359_v10 = vld [vmem:[#allocation7 + $0x8] sm:$0xff]  ;;  %s268_s6 = scalar_lea.vmem [#allocation8], %s570_s10  ;;  %s468_s9 = scalar_lea.hbm %s1031_s5, %s580_s14 }
  0x5a   : > { %587 = vmatpush3.msra.mxu0 %v270_v2  ;;  %407 = vmatpush1.msra.mxu1 %v364_v5  ;;  %v358_v11 = vld [vmem:[#allocation7] sm:$0xff]  ;;  %v370_v19 = vsub.s32 0, %v369_v18  ;;  %v374_v21 = vsub.s32 1, %v369_v18  ;;  %s470_s7 = sshll.u32 %s268_s6, 4  ;;  %s456_s11 = scalar_lea.sflag [#allocation4], %s972_s15  ;;  %s471_s7 = int_to_ptr.vmem [resolvable:$true] %s470_s7 }
  0x5b   : > { %589 = vmatmul.mubr.msk.f32.vlgmr.msra.gmra.mxu0 %vm279_vm2, %v269_v3  ;;  %408 = vmatprep.subr.mxu1 %v363_v6  ;;  %v571_v12 = vld [vmem:[%s1028_s2] ss:$0 sm:$0xff]  ;;  %s744_s16 = scalar_lea.vmem %s471_s7, 256  ;;  %p1047_p11 = scmp.ne.s32.totalorder %s1041_s30, 0 }
  0x5c   : > { %409 = vmatpush1.msra.mxu1 %v362_v7  ;;  %v366_v20 = vld [vmem:[%s1030_s4] sm:$0x3]  ;;  %p745_p7 = scmp.ne.s32.totalorder %s471_s7, %s744_s16  ;;  %s823_s23 = smov [#allocation8]  }
  0x5d   : > { %410 = vmatprep.subr.mxu1 %v361_v8  ;;  %v371_v22 = vrot.slane %v366_v20, %v370_v19  ;;  %v375_v23 = vrot.slane %v366_v20, %v374_v21  ;;  %s748_s22 = sshll.u32 %s823_s23, 4  ;;  %s749_s22 = int_to_ptr.vmem [resolvable:$false] %s748_s22 }
  0x5e   : > { %411 = vmatpush1.msra.mxu1 %v360_v9  ;;  %p746_p1 = pnand %p745_p7, %p1047_p11  ;;  %s750_s27 = scalar_lea.vmem %s749_s22, 512 }
  0x5f   : > { %412 = vmatprep.subr.mxu1 %v359_v10  ;;  %p751_p6 = scmp.lt.s32.totalorder %s471_s7, %s749_s22  ;;  %p752_p12 = scmp.lt.s32.totalorder %s750_s27, %s744_s16 }
  0x60   : > { %413 = vmatpush1.msra.mxu1 %v358_v11  ;;  %p747_p2 = pneg %p746_p1 }
  0x61   : > { %p753_p3 = por %p752_p12, %p751_p6 }
  0x63   : > { %p754_p9 = pnand %p753_p3, %p747_p2 }
 0x11b   : > { %v353_v13 = vpop.f32.mrf.mxu0 }
 0x11c   : > { %v354_v14 = vadd.f32 %v571_v12, %v353_v13 }
 0x11d   : > { %v590_v15 = vpop.f32.mrf.mxu0 }
 0x11e   : > { %v357_v16 = vmax.f32 %v354_v14, 0.0 }
 0x120   : > { %574 = vmatmul.mubr.msk.f32.vlgmr.msra.gmra.mxu1 %vm378_vm3, %v357_v16 }
 0x1e0   : > { %v448_v24 = vpop.f32.mrf.mxu1 }
 0x1e1   : > { %v449_v25 = vadd.f32 %v448_v24, %v371_v22 }
 0x1e2   : > { %v450_v26 = vpop.f32.mrf.mxu1 }
 0x1e3   : > { %453 = vst [vmem:[%s268_s6] sm:$0xff] %v449_v25  ;;  %v451_v27 = vadd.f32 %v450_v26, %v375_v23 }
 0x1e5   : > { %454 = vst [vmem:[%s268_s6 + $0x8] sm:$0xff] %v451_v27 }
 0x1e6   : > { %757 = shalt.err (!%p754_p9)
}
 0x1e7   : > { %s758_s24 = scalar_lea.hbm %s468_s9, 256  ;;  %s762_s10 = scalar_lea.hbm %s1031_s5, 512 }
 0x1e8   : > { %p759_p13 = scmp.ne.s32.totalorder %s468_s9, %s758_s24  ;;  %p763_p0 = scmp.lt.s32.totalorder %s468_s9, %s1031_s5 }
 0x1e9   : > { %p764_p4 = scmp.lt.s32.totalorder %s762_s10, %s758_s24 }
 0x1ea   : > { %p760_p5 = pnand %p759_p13, %p1047_p11 }
 0x1eb   : > { %p765_p8 = por %p764_p4, %p763_p0 }
 0x1ec   : > { %p761_p10 = pneg %p760_p5 }
 0x1ee   : > { %p766_p7 = pnand %p765_p8, %p761_p10 }
 0x1f0   : > { %769 = shalt.err (!%p766_p7)
}
 0x1f1   : > { %601 = dma.vmem_to_hbm [thread:$0]  (%p1047_p11), %s471_s7, 256, %s468_s9, %s456_s11  }
 0x1f2 PF: > { %s482_s14 = sand.u32 1, %s800_s18   ;;  %p1048_p1 = scmp.ne.s32.totalorder %s1037_s25, 0 }
 0x1f3   : > { %p1049_p2 = scmp.ge.s32.totalorder %s812_s21, 2  ;;  %s483_s6 = scalar_lea.sflag [#allocation4], %s482_s14 }
 0x1f5   : > { %p615_p6 = pnand %p1049_p2, %p1048_p1 }
 0x1f7   : > { %p616_p12 = pneg %p615_p6 }
 0x1f9   : > { %795 = dma.done.wait (%p616_p12), %s483_s6, 256  }
 0x1fa   : > { %797 = vsyncadd (%p616_p12), %s483_s6, 4294967040  ;;  %p19_p3 = scmp.ge.s32.totalorder %s926_s17, 4   ;;  %s1050_s18 = smov %s804_s19 }
 0x1fb   : > { %s1051_s19 = smov %s808_s20  ;;  %s1052_s20 = smov %s935_s28 }
 0x1fc   : > { %s1053_s21 = smov %s926_s17  ;;  %21 = sbr.rel (!%p19_p3) target bundleno = 6 (0x6), region = 93 }
 0x201   :  { %488 = vsyncpa [#allocation3], 1 }
 0x202   :  { %490 = vsyncpa [#allocation3 + $0x1], 1 }
 0x203   :  { %491 = vsyncpa [#allocation6], 1 }
 0x204   :  { %492 = vsyncpa [#allocation4], 1 }
 0x205   :  { %494 = vsyncpa [#allocation4 + $0x1], 1 }

</bundles_post_ra>
